<compile_context>
chip_gen: v5e
topology: v5e:2x2
jax: 0.10.0
libtpu: 0.0.40
codegen_flags: <defaults>
</compile_context>

<pallas_src>
import jax
import jax.numpy as jnp
from jax.experimental import pallas as pl
from jax.experimental.pallas import tpu as pltpu

HIDDEN_DIM = 32
LEAKY_SLOPE = 0.01   # nn.LeakyReLU() default
LN_EPS = 1e-5        # nn.LayerNorm default
LANE = 128


def _round_up(n, m):
    return ((n + m - 1) // m) * m


def _leaky_relu(x):
    return jnp.where(x >= 0.0, x, LEAKY_SLOPE * x)


def _layer_norm(x, gamma, beta):
    mean = jnp.mean(x, axis=-1, keepdims=True)
    xc = x - mean                              # centered value reused below
    var = jnp.mean(xc * xc, axis=-1, keepdims=True)
    return xc * jax.lax.rsqrt(var + LN_EPS) * gamma + beta


def critic_kernel(x_ref, w1_ref, w2_ref, wq_ref, vec_ref, out_ref):
    op_dim = out_ref.shape[-1]

    # Single DMA for all small per-feature parameters; static row/lane slices.
    vecs = vec_ref[...]                        # (8, VW) f32
    b1 = vecs[0:1, :HIDDEN_DIM]
    g1 = vecs[1:2, :HIDDEN_DIM]
    be1 = vecs[2:3, :HIDDEN_DIM]
    b2 = vecs[3:4, :HIDDEN_DIM]
    g2 = vecs[4:5, :HIDDEN_DIM]
    be2 = vecs[5:6, :HIDDEN_DIM]
    bq = vecs[6:7, :op_dim]                    # (1, op_dim)

    x = x_ref[...]                             # f32; exact PyTorch semantics

    # layer 1: Linear -> LeakyReLU -> LayerNorm
    h = jnp.dot(x, w1_ref[...], preferred_element_type=jnp.float32) + b1
    h = _layer_norm(_leaky_relu(h), g1, be1)

    # layer 2: Linear -> LeakyReLU -> LayerNorm
    h = jnp.dot(h, w2_ref[...], preferred_element_type=jnp.float32) + b2
    h = _layer_norm(_leaky_relu(h), g2, be2)

    # output head: narrow (tile_b, op_dim) store; the tail block's OOB rows
    # (if B % tile_b != 0) are discarded by Pallas on write.
    q = jnp.dot(h, wq_ref[...], preferred_element_type=jnp.float32) + bq
    out_ref[...] = q.astype(out_ref.dtype)


def _choose_tile(batch, tile_b):
    """Multiple of 8; >= 2 grid steps when the batch allows it (v7x megacore)."""
    tile_b = max(8, (int(tile_b) // 8) * 8)
    if batch >= 16:
        tile_b = min(tile_b, _round_up(pl.cdiv(batch, 2), 8))
    else:
        tile_b = min(tile_b, _round_up(batch, 8))
    return tile_b


def critic_forward(x, params, *, tile_b=2048):
    """x: [B, iDim]; params: dict from init_params. Returns [B, op_dim] f32."""
    # Mirrors tc.tensor(x).float(); a no-op when the caller already passes f32.
    x = jnp.asarray(x, jnp.float32)
    B, i_dim = x.shape
    op_dim = params["wq"].shape[1]

    # Pack the 7 small vectors into one (8, VW) f32 block (one DMA).
    vw = max(LANE, _round_up(max(HIDDEN_DIM, op_dim), LANE))
    vec = jnp.zeros((8, vw), jnp.float32)
    for row, name in enumerate(("b1", "g1", "be1", "b2", "g2", "be2")):
        vec = vec.at[row, :HIDDEN_DIM].set(params[name].reshape(-1))
    vec = vec.at[6, :op_dim].set(params["bq"].reshape(-1))

    w1 = params["w1"].astype(jnp.float32)
    w2 = params["w2"].astype(jnp.float32)
    wq = params["wq"].astype(jnp.float32)      # (HIDDEN_DIM, op_dim), unpadded

    tile_b = _choose_tile(B, tile_b)
    grid = (pl.cdiv(B, tile_b),)               # no wrapper-side padding of x

    def resident(a):                           # full-array, constant index map
        return pl.BlockSpec(a.shape, lambda i: (0, 0))

    return pl.pallas_call(
        critic_kernel,
        out_shape=jax.ShapeDtypeStruct((B, op_dim), jnp.float32),
        grid=grid,
        in_specs=[
            pl.BlockSpec((tile_b, i_dim), lambda i: (i, 0)),   # streamed x
            resident(w1), resident(w2), resident(wq), resident(vec),
        ],
        out_specs=pl.BlockSpec((tile_b, op_dim), lambda i: (i, 0)),
        compiler_params=pltpu.CompilerParams(
            dimension_semantics=("parallel",)),
    )(x, w1, w2, wq, vec)


def init_params(key, ip_dim, op_dim, hidden=HIDDEN_DIM):
    """Deterministic synthetic init (matches shapes of critic_nw.__init__)."""
    ks = jax.random.split(key, 6)

    def lin(kw, kb, fan_in, fan_out):
        # PyTorch nn.Linear default: U(-1/sqrt(fan_in), 1/sqrt(fan_in))
        bound = 1.0 / jnp.sqrt(fan_in)
        w = jax.random.uniform(kw, (fan_in, fan_out), jnp.float32, -bound, bound)
        b = jax.random.uniform(kb, (1, fan_out), jnp.float32, -bound, bound)
        return w, b

    w1, b1 = lin(ks[0], ks[1], ip_dim, hidden)
    w2, b2 = lin(ks[2], ks[3], hidden, hidden)
    wq, bq = lin(ks[4], ks[5], hidden, op_dim)

    return {
        "w1": w1, "b1": b1,
        "g1": jnp.ones((1, hidden), jnp.float32),
        "be1": jnp.zeros((1, hidden), jnp.float32),
        "w2": w2, "b2": b2,
        "g2": jnp.ones((1, hidden), jnp.float32),
        "be2": jnp.zeros((1, hidden), jnp.float32),
        "wq": wq, "bq": bq,
    }


def critic_reference(x, p):
    """Pure-JAX f32 reference (HIGHEST-precision dots)."""
    hp = jax.lax.Precision.HIGHEST

    def dot(a, w):
        return jnp.dot(a, w, precision=hp)

    def ln(h, g, b):
        m = jnp.mean(h, axis=-1, keepdims=True)
        hc = h - m
        v = jnp.mean(hc * hc, axis=-1, keepdims=True)
        return hc * jax.lax.rsqrt(v + LN_EPS) * g + b

    h = dot(jnp.asarray(x, jnp.float32), p["w1"]) + p["b1"]
    h = ln(jnp.where(h >= 0, h, LEAKY_SLOPE * h), p["g1"], p["be1"])
    h = dot(h, p["w2"]) + p["b2"]
    h = ln(jnp.where(h >= 0, h, LEAKY_SLOPE * h), p["g2"], p["be2"])
    return dot(h, p["wq"]) + p["bq"]


if __name__ == "__main__":
    key = jax.random.PRNGKey(0)
    k_x, k_x2, k_p = jax.random.split(key, 3)

    ip_dim, op_dim = 24, 4
    params = init_params(k_p, ip_dim, op_dim)

    # Small batch (single grid step).
    x = jax.random.normal(k_x, (8, ip_dim), jnp.float32)
    q = jax.block_until_ready(critic_forward(x, params))
    assert q.shape == (8, op_dim)
    q_ref = critic_reference(x, params)
    assert jnp.allclose(q, q_ref, atol=2e-2, rtol=2e-2), "mismatch vs f32 reference"

    # Batch not divisible by the tile: exercises the >=2-step grid (megacore
    # split) and the partial tail block (no wrapper pad / no output slice).
    x2 = jax.random.normal(k_x2, (300, ip_dim), jnp.float32)
    q2 = jax.block_until_ready(critic_forward(x2, params))
    assert q2.shape == (300, op_dim)
    q2_ref = critic_reference(x2, params)
    assert jnp.allclose(q2, q2_ref, atol=2e-2, rtol=2e-2), "mismatch on gridded path"
    assert bool(jnp.all(jnp.isfinite(q2)))

    # Small explicit tile: multi-step grid with a ragged tail block.
    q3 = jax.block_until_ready(critic_forward(x2, params, tile_b=64))
    assert q3.shape == (300, op_dim)
    assert jnp.allclose(q3, q2_ref, atol=2e-2, rtol=2e-2), "mismatch with tile_b=64"

    print("KERNEL_OK")
</pallas_src>

<mosaic_0001>
module attributes {stable_mosaic.version = 11 : i64} {
  func.func @critic_kernel(%arg0: i32, %arg1: memref<8x24xf32, #tpu.memory_space<vmem>>, %arg2: memref<24x32xf32, #tpu.memory_space<vmem>>, %arg3: memref<32x32xf32, #tpu.memory_space<vmem>>, %arg4: memref<32x4xf32, #tpu.memory_space<vmem>>, %arg5: memref<8x128xf32, #tpu.memory_space<vmem>>, %arg6: memref<8x4xf32, #tpu.memory_space<vmem>>) attributes {dimension_semantics = [#tpu.dimension_semantics<parallel>], iteration_bounds = array<i64: 1>, scalar_prefetch = 0 : i64, scratch_operands = 0 : i64, tpu.core_type = #tpu.core_type<tc>, window_params = [{transform_indices = @transform_0, window_bounds = array<i64: 8, 24>}, {pipeline_mode = #tpu.pipeline_mode<synchronous>, transform_indices = @transform_1, window_bounds = array<i64: 24, 32>}, {pipeline_mode = #tpu.pipeline_mode<synchronous>, transform_indices = @transform_2, window_bounds = array<i64: 32, 32>}, {pipeline_mode = #tpu.pipeline_mode<synchronous>, transform_indices = @transform_3, window_bounds = array<i64: 32, 4>}, {pipeline_mode = #tpu.pipeline_mode<synchronous>, transform_indices = @transform_4, window_bounds = array<i64: 8, 128>}, {transform_indices = @transform_5, window_bounds = array<i64: 8, 4>}]} {
    %c0 = arith.constant 0 : index
    %c0_0 = arith.constant 0 : index
    %0 = vector.load %arg5[%c0, %c0_0] : memref<8x128xf32, #tpu.memory_space<vmem>>, vector<8x128xf32>
    %1 = vector.extract_strided_slice %0 {offsets = [0, 0], sizes = [1, 32], strides = [1, 1]} : vector<8x128xf32> to vector<1x32xf32>
    %2 = vector.extract_strided_slice %0 {offsets = [1, 0], sizes = [1, 32], strides = [1, 1]} : vector<8x128xf32> to vector<1x32xf32>
    %3 = vector.extract_strided_slice %0 {offsets = [2, 0], sizes = [1, 32], strides = [1, 1]} : vector<8x128xf32> to vector<1x32xf32>
    %4 = vector.extract_strided_slice %0 {offsets = [3, 0], sizes = [1, 32], strides = [1, 1]} : vector<8x128xf32> to vector<1x32xf32>
    %5 = vector.extract_strided_slice %0 {offsets = [4, 0], sizes = [1, 32], strides = [1, 1]} : vector<8x128xf32> to vector<1x32xf32>
    %6 = vector.extract_strided_slice %0 {offsets = [5, 0], sizes = [1, 32], strides = [1, 1]} : vector<8x128xf32> to vector<1x32xf32>
    %7 = vector.extract_strided_slice %0 {offsets = [6, 0], sizes = [1, 4], strides = [1, 1]} : vector<8x128xf32> to vector<1x4xf32>
    %c0_1 = arith.constant 0 : index
    %c0_2 = arith.constant 0 : index
    %8 = vector.load %arg1[%c0_1, %c0_2] : memref<8x24xf32, #tpu.memory_space<vmem>>, vector<8x24xf32>
    %c0_3 = arith.constant 0 : index
    %c0_4 = arith.constant 0 : index
    %9 = vector.load %arg2[%c0_3, %c0_4] : memref<24x32xf32, #tpu.memory_space<vmem>>, vector<24x32xf32>
    %cst = arith.constant dense<0.000000e+00> : vector<8x32xf32>
    %10 = tpu.matmul %8, %9, %cst {dimension_numbers = #tpu.dot_dimension_numbers<[1], [0], [0], [1], [0, 0, 1, 1], [], []>} : vector<8x24xf32>, vector<24x32xf32>, vector<8x32xf32> -> vector<8x32xf32>
    %11 = vector.broadcast %1 : vector<1x32xf32> to vector<8x32xf32>
    %12 = arith.addf %10, %11 : vector<8x32xf32>
    %cst_5 = arith.constant 0.000000e+00 : f32
    %13 = vector.broadcast %cst_5 : f32 to vector<8x32xf32>
    %14 = arith.cmpf oge, %12, %13 : vector<8x32xf32>
    %cst_6 = arith.constant 0.00999999977 : f32
    %15 = vector.broadcast %cst_6 : f32 to vector<8x32xf32>
    %16 = arith.mulf %15, %12 : vector<8x32xf32>
    %17 = arith.select %14, %12, %16 : vector<8x32xi1>, vector<8x32xf32>
    %cst_7 = arith.constant dense<0.000000e+00> : vector<8xf32>
    %18 = vector.multi_reduction <add>, %17, %cst_7 [1] : vector<8x32xf32> to vector<8xf32>
    %19 = vector.shape_cast %18 : vector<8xf32> to vector<8x1xf32>
    %cst_8 = arith.constant 3.200000e+01 : f32
    %20 = vector.broadcast %cst_8 : f32 to vector<8x1xf32>
    %21 = arith.divf %19, %20 : vector<8x1xf32>
    %22 = vector.broadcast %21 : vector<8x1xf32> to vector<8x32xf32>
    %23 = arith.subf %17, %22 : vector<8x32xf32>
    %24 = arith.mulf %23, %23 : vector<8x32xf32>
    %cst_9 = arith.constant dense<0.000000e+00> : vector<8xf32>
    %25 = vector.multi_reduction <add>, %24, %cst_9 [1] : vector<8x32xf32> to vector<8xf32>
    %26 = vector.shape_cast %25 : vector<8xf32> to vector<8x1xf32>
    %cst_10 = arith.constant 3.200000e+01 : f32
    %27 = vector.broadcast %cst_10 : f32 to vector<8x1xf32>
    %28 = arith.divf %26, %27 : vector<8x1xf32>
    %cst_11 = arith.constant 9.99999974E-6 : f32
    %29 = vector.broadcast %cst_11 : f32 to vector<8x1xf32>
    %30 = arith.addf %28, %29 : vector<8x1xf32>
    %31 = math.rsqrt %30 : vector<8x1xf32>
    %32 = vector.broadcast %31 : vector<8x1xf32> to vector<8x32xf32>
    %33 = arith.mulf %23, %32 : vector<8x32xf32>
    %34 = vector.broadcast %2 : vector<1x32xf32> to vector<8x32xf32>
    %35 = arith.mulf %33, %34 : vector<8x32xf32>
    %36 = vector.broadcast %3 : vector<1x32xf32> to vector<8x32xf32>
    %37 = arith.addf %35, %36 : vector<8x32xf32>
    %c0_12 = arith.constant 0 : index
    %c0_13 = arith.constant 0 : index
    %38 = vector.load %arg3[%c0_12, %c0_13] : memref<32x32xf32, #tpu.memory_space<vmem>>, vector<32x32xf32>
    %cst_14 = arith.constant dense<0.000000e+00> : vector<8x32xf32>
    %39 = tpu.matmul %37, %38, %cst_14 {dimension_numbers = #tpu.dot_dimension_numbers<[1], [0], [0], [1], [0, 0, 1, 1], [], []>} : vector<8x32xf32>, vector<32x32xf32>, vector<8x32xf32> -> vector<8x32xf32>
    %40 = vector.broadcast %4 : vector<1x32xf32> to vector<8x32xf32>
    %41 = arith.addf %39, %40 : vector<8x32xf32>
    %cst_15 = arith.constant 0.000000e+00 : f32
    %42 = vector.broadcast %cst_15 : f32 to vector<8x32xf32>
    %43 = arith.cmpf oge, %41, %42 : vector<8x32xf32>
    %cst_16 = arith.constant 0.00999999977 : f32
    %44 = vector.broadcast %cst_16 : f32 to vector<8x32xf32>
    %45 = arith.mulf %44, %41 : vector<8x32xf32>
    %46 = arith.select %43, %41, %45 : vector<8x32xi1>, vector<8x32xf32>
    %cst_17 = arith.constant dense<0.000000e+00> : vector<8xf32>
    %47 = vector.multi_reduction <add>, %46, %cst_17 [1] : vector<8x32xf32> to vector<8xf32>
    %48 = vector.shape_cast %47 : vector<8xf32> to vector<8x1xf32>
    %cst_18 = arith.constant 3.200000e+01 : f32
    %49 = vector.broadcast %cst_18 : f32 to vector<8x1xf32>
    %50 = arith.divf %48, %49 : vector<8x1xf32>
    %51 = vector.broadcast %50 : vector<8x1xf32> to vector<8x32xf32>
    %52 = arith.subf %46, %51 : vector<8x32xf32>
    %53 = arith.mulf %52, %52 : vector<8x32xf32>
    %cst_19 = arith.constant dense<0.000000e+00> : vector<8xf32>
    %54 = vector.multi_reduction <add>, %53, %cst_19 [1] : vector<8x32xf32> to vector<8xf32>
    %55 = vector.shape_cast %54 : vector<8xf32> to vector<8x1xf32>
    %cst_20 = arith.constant 3.200000e+01 : f32
    %56 = vector.broadcast %cst_20 : f32 to vector<8x1xf32>
    %57 = arith.divf %55, %56 : vector<8x1xf32>
    %cst_21 = arith.constant 9.99999974E-6 : f32
    %58 = vector.broadcast %cst_21 : f32 to vector<8x1xf32>
    %59 = arith.addf %57, %58 : vector<8x1xf32>
    %60 = math.rsqrt %59 : vector<8x1xf32>
    %61 = vector.broadcast %60 : vector<8x1xf32> to vector<8x32xf32>
    %62 = arith.mulf %52, %61 : vector<8x32xf32>
    %63 = vector.broadcast %5 : vector<1x32xf32> to vector<8x32xf32>
    %64 = arith.mulf %62, %63 : vector<8x32xf32>
    %65 = vector.broadcast %6 : vector<1x32xf32> to vector<8x32xf32>
    %66 = arith.addf %64, %65 : vector<8x32xf32>
    %c0_22 = arith.constant 0 : index
    %c0_23 = arith.constant 0 : index
    %67 = vector.load %arg4[%c0_22, %c0_23] : memref<32x4xf32, #tpu.memory_space<vmem>>, vector<32x4xf32>
    %cst_24 = arith.constant dense<0.000000e+00> : vector<8x4xf32>
    %68 = tpu.matmul %66, %67, %cst_24 {dimension_numbers = #tpu.dot_dimension_numbers<[1], [0], [0], [1], [0, 0, 1, 1], [], []>} : vector<8x32xf32>, vector<32x4xf32>, vector<8x4xf32> -> vector<8x4xf32>
    %69 = vector.broadcast %7 : vector<1x4xf32> to vector<8x4xf32>
    %70 = arith.addf %68, %69 : vector<8x4xf32>
    %c0_25 = arith.constant 0 : index
    %c0_26 = arith.constant 0 : index
    %71 = vector.load %arg6[%c0_25, %c0_26] : memref<8x4xf32, #tpu.memory_space<vmem>>, vector<8x4xf32>
    tpu.vector_store %arg6[%c0_25, %c0_26], %70 {strides = array<i32>} : memref<8x4xf32, #tpu.memory_space<vmem>>, vector<8x4xf32>,
    return
  }
  func.func @transform_0(%arg0: i32) -> (i32, i32) {
    %c0_i32 = arith.constant 0 : i32
    %c0_i32_0 = arith.constant 0 : i32
    return %arg0, %c0_i32 : i32, i32
  }
  func.func @transform_1(%arg0: i32) -> (i32, i32) {
    %c0_i32 = arith.constant 0 : i32
    %c0_i32_0 = arith.constant 0 : i32
    %c0_i32_1 = arith.constant 0 : i32
    return %c0_i32, %c0_i32_0 : i32, i32
  }
  func.func @transform_2(%arg0: i32) -> (i32, i32) {
    %c0_i32 = arith.constant 0 : i32
    %c0_i32_0 = arith.constant 0 : i32
    %c0_i32_1 = arith.constant 0 : i32
    return %c0_i32, %c0_i32_0 : i32, i32
  }
  func.func @transform_3(%arg0: i32) -> (i32, i32) {
    %c0_i32 = arith.constant 0 : i32
    %c0_i32_0 = arith.constant 0 : i32
    %c0_i32_1 = arith.constant 0 : i32
    return %c0_i32, %c0_i32_0 : i32, i32
  }
  func.func @transform_4(%arg0: i32) -> (i32, i32) {
    %c0_i32 = arith.constant 0 : i32
    %c0_i32_0 = arith.constant 0 : i32
    %c0_i32_1 = arith.constant 0 : i32
    return %c0_i32, %c0_i32_0 : i32, i32
  }
  func.func @transform_5(%arg0: i32) -> (i32, i32) {
    %c0_i32 = arith.constant 0 : i32
    %c0_i32_0 = arith.constant 0 : i32
    return %arg0, %c0_i32 : i32, i32
  }
}

</mosaic_0001>

<bundles_post_ra>
// kernel: tpu_custom_call.1
= control target key start
LH: loop header
LB: loop body
LE: loop exit
PB: predicated region body
PF: predicated region fallthrough
CT: control target
= control target key end

     0   :  { %10 = vsyncpa [#allocation3], 0  ;;  %s401_s0 = inlined_call_operand.hbm [shape: f32[8,24], index: 0, kind: input, shape index: {}]   ;;  %s402_s1 = inlined_call_operand.hbm [shape: f32[24,32], index: 1, kind: input, shape index: {}]   ;;  %s403_s2 = inlined_call_operand.vmem [shape: f32[32,32], index: 2, kind: input, shape index: {}]   ;;  %s404_s3 = inlined_call_operand.vmem [shape: f32[32,4], index: 3, kind: input, shape index: {}]   ;;  %s405_s4 = inlined_call_operand.hbm [shape: f32[8,128], index: 4, kind: input, shape index: {}]   ;;  %s406_s5 = inlined_call_operand.vmem [shape: f32[8,4], index: 5, kind: output, shape index: {}]  }
   0x1   :  { %11 = vsyncpa [#allocation5], 0  ;;  %s27_s20 = sshll.u32 %s402_s1, 4  ;;  %s314_s21 = smov [#allocation4]   ;;  %s28_s20 = int_to_ptr.hbm [resolvable:$true] %s27_s20 }
   0x2   :  { %s29_s22 = sshll.u32 %s314_s21, 4  ;;  %s17_s25 = sshll.u32 %s401_s0, 4  ;;  %s30_s22 = int_to_ptr.vmem [resolvable:$true] %s29_s22  ;;  %s18_s25 = int_to_ptr.hbm [resolvable:$true] %s17_s25 }
   0x3   :  { %s315_s26 = smov 128   ;;  %s316_s27 = smov 8  }
   0x4   :  { %35 = dma.hbm_to_vmem [thread:$0]  %s28_s20, 384, %s30_s22, [#allocation5], %s315_s26, %s315_s26, %s316_s27  }
   0x5   :  { %s317_s28 = smov [#allocation2]   ;;  %s45_s7 = sshll.u32 %s405_s4, 4  ;;  %s46_s7 = int_to_ptr.hbm [resolvable:$true] %s45_s7 }
   0x6   :  { %s19_s29 = sshll.u32 %s317_s28, 4  ;;  %s318_s1 = smov [#allocation6]   ;;  %s20_s29 = int_to_ptr.vmem [resolvable:$true] %s19_s29 }
   0x7   :  { %22 = dma.hbm_to_vmem [thread:$0]  %s18_s25, 128, %s20_s29, [#allocation3]  }
   0x8   :  { %s47_s8 = sshll.u32 %s318_s1, 4  ;;  %s48_s8 = int_to_ptr.vmem [resolvable:$true] %s47_s8 }
   0x9   :  { %50 = dma.hbm_to_vmem [thread:$0]  %s46_s7, 128, %s48_s8, [#allocation5]  }
   0xa   :  { %310 = dma.done.wait [#allocation3], 128  }
   0xb   :  { %311 = vsyncadd [#allocation3], 4294967168 }
   0xc   :  { %312 = dma.done.wait [#allocation5], 512  }
   0xd   :  { %313 = vsyncadd [#allocation5], 4294966784  ;;  %v67_v0 = vld [vmem:[#allocation4 + $0x10] sm:$0xff]  ;;  %v66_v1 = vld [vmem:[#allocation4 + $0x8] sm:$0xff]  ;;  %vm69_vm0 = vcmask 195584   ;;  %vm96_vm2 = vcmask 261120  }
   0xe   :  { %86 = vmatpush.msra.mxu0 %v67_v0  ;;  %v65_v2 = vld [vmem:[#allocation4] sm:$0xff]  ;;  %v64_v3 = vld [vmem:[#allocation2] sm:$0xff]  ;;  %v319_v11 = vmov 32.0   ;;  %v133_v23 = vld [vmem:[%s403_s2 + $0x18] sm:$0xff]  ;;  %vm215_vm11 = vcmask 31744  }
   0xf   :  { %v359_v4 = vld [vmem:[#allocation6] sm:$0xff]  ;;  %232 = vrcp.f32 %v319_v11  ;;  %150 = vmatpush.msra.mxu1 %v133_v23  ;;  %v132_v24 = vld [vmem:[%s403_s2 + $0x10] sm:$0xff]  ;;  %v131_v25 = vld [vmem:[%s403_s2 + $0x8] sm:$0xff] }
  0x10   :  { %87 = vmatpush.msra.mxu0 %v66_v1  ;;  %v68_v5 = vperm.slane %v359_v4, 0  ;;  %v130_v26 = vld [vmem:[%s403_s2] sm:$0xff]  ;;  %v126_v36 = vperm.slane %v359_v4, 1  ;;  %v128_v39 = vperm.slane %v359_v4, 2  ;;  %v134_v42 = vperm.slane %v359_v4, 3  ;;  %v190_v53 = vld [vmem:[%s404_s3 + $0x18] sm:$0xff] }
  0x11   :  { %151 = vmatpush.msra.mxu1 %v132_v24  ;;  %207 = vmatpush.msra.mxu2 %v190_v53  ;;  %v189_v54 = vld [vmem:[%s404_s3 + $0x10] sm:$0xff]  ;;  %v188_v55 = vld [vmem:[%s404_s3 + $0x8] sm:$0xff]  ;;  %v187_v56 = vld [vmem:[%s404_s3] sm:$0xff] }
  0x12   :  { %88 = vmatpush.msra.mxu0 %v65_v2  ;;  %v183_v2 = vperm.slane %v359_v4, 4 }
  0x13   :  { %223 = vmatmul.msk.f32.vlgmr.msra.gmra.mxu0 %vm69_vm0, %v64_v3  ;;  %152 = vmatpush.msra.mxu1 %v131_v25 }
  0x14   :  { %208 = vmatpush.msra.mxu2 %v189_v54 }
  0x15   :  { %v233_v12 = vpop.eup %232  ;;  %153 = vmatpush.msra.mxu1 %v130_v26 }
  0x16   :  { %v101_v13 = vmul.f32 32.0, %v233_v12  ;;  %vm105_vm3 = vweird.f32 %v233_v12  ;;  %209 = vmatpush.msra.mxu2 %v188_v55 }
  0x18   :  { %v102_v14 = vsub.f32 1.0, %v101_v13  ;;  %210 = vmatpush.msra.mxu2 %v187_v56 }
  0x1a   :  { %v103_v15 = vmul.f32 %v233_v12, %v102_v14 }
  0x1c   :  { %v104_v16 = vadd.f32 %v233_v12, %v103_v15 }
  0x1e   :  { %v106_v17 = vsel %vm105_vm3, %v233_v12, %v104_v16 }
  0x90   :  { %v90_v6 = vpop.f32.mrf.mxu0 }
  0x91   :  { %v91_v7 = vadd.f32 %v90_v6, %v68_v5  ;;  %v185_v6 = vperm.slane %v359_v4, 5 }
  0x93   :  { %v94_v8 = vmul.f32 0.01, %v91_v7  ;;  %vm93_vm1 = vcmp.ge.f32.partialorder %v91_v7, 0.0 }
  0x95   :  { %v95_v9 = vsel %vm93_vm1, %v91_v7, %v94_v8 }
  0x96   :  { %v97_v10 = vsel %vm96_vm2, %v95_v9, 0.0 }
  0x97   :  { %98 = vadd.xlane.f32.xlu0 %v97_v10 }
 0x10a   :  { %v99_v18 = vpop.xlane.xlu0 %98 }
 0x10b   :  { %v107_v19 = vmul.f32 %v106_v17, %v99_v18 }
 0x10d   :  { %v108_v20 = vsub.f32 %v95_v9, %v107_v19  ;;  %v191_v9 = vperm.slane %v359_v4, 6 }
 0x10f   :  { %v109_v21 = vmul.f32 %v108_v20, %v108_v20 }
 0x111   :  { %v110_v22 = vsel %vm96_vm2, %v109_v21, 0.0 }
 0x112   :  { %111 = vadd.xlane.f32.xlu0 %v110_v22 }
 0x185   :  { %v112_v27 = vpop.xlane.xlu0 %111 }
 0x186   :  { %v113_v28 = vmul.f32 %v112_v27, %v106_v17 }
 0x188   :  { %v114_v29 = vadd.f32 1e-05, %v113_v28 }
 0x18a   :  { %234 = vrsqrt.f32 %v114_v29  ;;  %vm121_vm5 = vweird.f32 %v114_v29 }
 0x190   :  { %v235_v30 = vpop.eup %234 }
 0x191   :  { %v116_v31 = vmul.f32 %v235_v30, %v114_v29  ;;  %vm122_vm4 = vweird.f32 %v235_v30 }
 0x192   :  { %vm123_vm6 = vmor %vm121_vm5, %vm122_vm4 }
 0x193   :  { %v117_v32 = vmul.f32 %v235_v30, %v116_v31 }
 0x195   :  { %v118_v33 = vmul.f32 0.5, %v117_v32 }
 0x197   :  { %v119_v34 = vsub.f32 1.5, %v118_v33 }
 0x199   :  { %v120_v35 = vmul.f32 %v235_v30, %v119_v34 }
 0x19b   :  { %v124_v37 = vsel %vm123_vm6, %v235_v30, %v120_v35 }
 0x19c   :  { %v125_v38 = vmul.f32 %v124_v37, %v108_v20 }
 0x19e   :  { %v127_v40 = vmul.f32 %v126_v36, %v125_v38 }
 0x1a0   :  { %v129_v41 = vadd.f32 %v128_v39, %v127_v40 }
 0x1a2   :  { %224 = vmatmul.msk.f32.vlgmr.msra.gmra.mxu1 %vm96_vm2, %v129_v41 }
 0x21f   :  { %v155_v43 = vpop.f32.mrf.mxu1 }
 0x220   :  { %v156_v44 = vadd.f32 %v155_v43, %v134_v42 }
 0x222   :  { %v159_v45 = vmul.f32 0.01, %v156_v44  ;;  %vm158_vm7 = vcmp.ge.f32.partialorder %v156_v44, 0.0 }
 0x224   :  { %v160_v46 = vsel %vm158_vm7, %v156_v44, %v159_v45 }
 0x225   :  { %v161_v47 = vsel %vm96_vm2, %v160_v46, 0.0 }
 0x226   :  { %162 = vadd.xlane.f32.xlu1 %v161_v47 }
 0x299   :  { %v163_v48 = vpop.xlane.xlu1 %162 }
 0x29a   :  { %v164_v49 = vmul.f32 %v163_v48, %v106_v17 }
 0x29c   :  { %v165_v50 = vsub.f32 %v160_v46, %v164_v49 }
 0x29e   :  { %v166_v51 = vmul.f32 %v165_v50, %v165_v50 }
 0x2a0   :  { %v167_v52 = vsel %vm96_vm2, %v166_v51, 0.0 }
 0x2a1   :  { %168 = vadd.xlane.f32.xlu1 %v167_v52 }
 0x314   :  { %v169_v57 = vpop.xlane.xlu1 %168 }
 0x315   :  { %v170_v58 = vmul.f32 %v169_v57, %v106_v17 }
 0x317   :  { %v171_v59 = vadd.f32 1e-05, %v170_v58 }
 0x319   :  { %236 = vrsqrt.f32 %v171_v59  ;;  %vm178_vm9 = vweird.f32 %v171_v59 }
 0x31f   :  { %v237_v60 = vpop.eup %236 }
 0x320   :  { %v173_v61 = vmul.f32 %v237_v60, %v171_v59  ;;  %vm179_vm8 = vweird.f32 %v237_v60 }
 0x321   :  { %vm180_vm10 = vmor %vm178_vm9, %vm179_vm8 }
 0x322   :  { %v174_v62 = vmul.f32 %v237_v60, %v173_v61 }
 0x324   :  { %v175_v63 = vmul.f32 0.5, %v174_v62 }
 0x326   :  { %v176_v0 = vsub.f32 1.5, %v175_v63 }
 0x328   :  { %v177_v1 = vmul.f32 %v237_v60, %v176_v0 }
 0x32a   :  { %v181_v3 = vsel %vm180_vm10, %v237_v60, %v177_v1 }
 0x32b   :  { %v182_v5 = vmul.f32 %v181_v3, %v165_v50 }
 0x32d   :  { %v184_v7 = vmul.f32 %v183_v2, %v182_v5 }
 0x32f   :  { %v186_v8 = vadd.f32 %v185_v6, %v184_v7 }
 0x331   :  { %225 = vmatmul.msk.f32.vlgmr.msra.gmra.mxu2 %vm96_vm2, %v186_v8 }
 0x3b4   :  { %v212_v10 = vpop.f32.mrf.mxu2 }
 0x3b5   :  { %v213_v11 = vadd.f32 %v212_v10, %v191_v9 }
 0x3b7   :  { %216 = vst.msk [vmem:[%s406_s5] sm:$0xff] %vm215_vm11, %v213_v11 }
 0x3b8   :  { %221 = vsyncpa [#allocation3], 1 }
 0x3b9   :  { %222 = vsyncpa [#allocation5], 1 }

</bundles_post_ra>
